<compile_context>
chip_gen: v6e
topology: v6e:2x2x1
jax: 0.10.0
libtpu: 0.0.40
codegen_flags: <defaults>
</compile_context>

<pallas_src>
import functools
import math

import jax
import jax.numpy as jnp
from jax.experimental import pallas as pl
from jax.experimental.pallas import tpu as pltpu


def _soft_wing_masked_kernel(pred_ref, label_ref, mask_ref, out_ref, *,
                             omega1, omega2, epsilon, B):
    # pred/label/mask tiles: [tm, 2K] in VMEM (any float dtype); cast in-kernel.
    p = pred_ref[...].astype(jnp.float32)
    t = label_ref[...].astype(jnp.float32)
    m = mask_ref[...].astype(jnp.float32)
    delta = jnp.abs(p - t)
    wing = omega2 * jnp.log(1.0 + delta / epsilon) + B      # EUP log, VPU rest
    losses = jnp.where(delta < omega1, delta, wing) * m
    out_ref[0, 0] = jnp.sum(losses)                          # per-tile partial sum


def _soft_wing_unmasked_kernel(pred_ref, label_ref, out_ref, *,
                               omega1, omega2, epsilon, B):
    p = pred_ref[...].astype(jnp.float32)
    t = label_ref[...].astype(jnp.float32)
    delta = jnp.abs(p - t)
    wing = omega2 * jnp.log(1.0 + delta / epsilon) + B
    losses = jnp.where(delta < omega1, delta, wing)
    out_ref[0, 0] = jnp.sum(losses)


def _pick_block_rows(lane_width, itemsize, n_streams):
    # Budget ~12 MiB for double-buffered input tiles (n_streams x 2 buffers),
    # which fits v5e's 16 MiB scoped-VMEM default and v6e/v7x comfortably.
    budget = 12 * 1024 * 1024
    per_row = max(1, 2 * n_streams * lane_width * itemsize)
    tm = budget // per_row
    return max(8, min(2048, (tm // 8) * 8))


def soft_wing_loss(pred, label, mask=None, *, omega1=2.0, omega2=20.0,
                   epsilon=0.5, block_rows=None):
    """SoftWingLoss forward.  pred/label: [N, K, 2]; mask: [N, K] or None."""
    N, K, C = pred.shape
    assert C == 2 and label.shape == (N, K, C)
    B = omega1 - omega2 * math.log(1.0 + omega1 / epsilon)
    L = 2 * K

    # Free, contiguous reshape (no transpose): lanes carry the 2K coordinates.
    pred2 = pred.reshape(N, L)
    label2 = label.reshape(N, L)
    masked = mask is not None
    if masked:
        # Expand mask once so its layout matches the flattened [N, 2K] coords.
        mask2 = jnp.broadcast_to(mask[:, :, None].astype(jnp.float32),
                                 (N, K, 2)).reshape(N, L)

    n_streams = 3 if masked else 2
    itemsize = max(jnp.dtype(pred.dtype).itemsize, 2)
    tm = block_rows if block_rows is not None else _pick_block_rows(L, itemsize, n_streams)

    if N <= tm:
        tm = N                      # single full-extent tile (any N allowed)
        n_pad = N
    else:
        tm = max(8, (tm // 8) * 8)  # second-to-last block dim multiple of 8
        n_pad = ((N + tm - 1) // tm) * tm

    if n_pad != N:
        pad = ((0, n_pad - N), (0, 0))
        # Zero rows are exact padding: delta = 0 -> loss = 0 (mask pads to 0).
        pred2 = jnp.pad(pred2, pad)
        label2 = jnp.pad(label2, pad)
        if masked:
            mask2 = jnp.pad(mask2, pad)

    num_tiles = n_pad // tm

    in_specs = [pl.BlockSpec((tm, L), lambda i: (i, 0)),
                pl.BlockSpec((tm, L), lambda i: (i, 0))]
    operands = [pred2, label2]
    if masked:
        in_specs.append(pl.BlockSpec((tm, L), lambda i: (i, 0)))
        operands.append(mask2)
        kernel = functools.partial(_soft_wing_masked_kernel, omega1=omega1,
                                   omega2=omega2, epsilon=epsilon, B=B)
    else:
        kernel = functools.partial(_soft_wing_unmasked_kernel, omega1=omega1,
                                   omega2=omega2, epsilon=epsilon, B=B)

    partials = pl.pallas_call(
        kernel,
        out_shape=jax.ShapeDtypeStruct((num_tiles, 1), jnp.float32),
        grid=(num_tiles,),
        in_specs=in_specs,
        out_specs=pl.BlockSpec((1, 1), lambda i: (i, 0),
                               memory_space=pltpu.MemorySpace.SMEM),
        compiler_params=pltpu.CompilerParams(
            dimension_semantics=("parallel",)),
    )(*operands)

    # Tiny epilogue: sum of per-tile partials, then mean over samples.
    return jnp.sum(partials) / jnp.float32(N)


if __name__ == "__main__":
    omega1, omega2, epsilon = 2.0, 20.0, 0.5
    B = omega1 - omega2 * math.log(1.0 + omega1 / epsilon)

    def reference(pred, label, mask=None):
        delta = jnp.abs(pred.astype(jnp.float32) - label.astype(jnp.float32))
        losses = jnp.where(delta < omega1, delta,
                           omega2 * jnp.log(1.0 + delta / epsilon) + B)
        if mask is not None:
            losses = losses * mask.astype(jnp.float32)[:, :, None]
        return jnp.mean(jnp.sum(losses, axis=(1, 2)))

    # Small single-tile case (exercises masked + unmasked paths).
    key = jax.random.PRNGKey(0)
    k1, k2, k3 = jax.random.split(key, 3)
    N, K = 4, 16
    pred = 3.0 * jax.random.normal(k1, (N, K, 2), dtype=jnp.float32)
    label = 3.0 * jax.random.normal(k2, (N, K, 2), dtype=jnp.float32)
    mask = (jax.random.uniform(k3, (N, K)) > 0.3).astype(jnp.float32)

    out_masked = jax.block_until_ready(soft_wing_loss(pred, label, mask))
    out_nomask = jax.block_until_ready(soft_wing_loss(pred, label, None))
    assert jnp.allclose(out_masked, reference(pred, label, mask), rtol=1e-5, atol=1e-4)
    assert jnp.allclose(out_nomask, reference(pred, label, None), rtol=1e-5, atol=1e-4)

    # Multi-tile + padding path (N not a multiple of the row tile).
    k4, k5, k6 = jax.random.split(jax.random.PRNGKey(1), 3)
    N2, K2 = 40, 16
    pred_b = 3.0 * jax.random.normal(k4, (N2, K2, 2), dtype=jnp.float32)
    label_b = 3.0 * jax.random.normal(k5, (N2, K2, 2), dtype=jnp.float32)
    mask_b = (jax.random.uniform(k6, (N2, K2)) > 0.5).astype(jnp.float32)
    out_b = jax.block_until_ready(soft_wing_loss(pred_b, label_b, mask_b, block_rows=16))
    assert jnp.allclose(out_b, reference(pred_b, label_b, mask_b), rtol=1e-5, atol=1e-4)

    print("KERNEL_OK")
</pallas_src>

<mosaic_0001>
module attributes {stable_mosaic.version = 11 : i64} {
  func.func @_soft_wing_masked_kernel(%arg0: i32, %arg1: memref<4x32xf32, #tpu.memory_space<vmem>>, %arg2: memref<4x32xf32, #tpu.memory_space<vmem>>, %arg3: memref<4x32xf32, #tpu.memory_space<vmem>>, %arg4: memref<1x1xf32, #tpu.memory_space<smem>>) attributes {dimension_semantics = [#tpu.dimension_semantics<parallel>], iteration_bounds = array<i64: 1>, scalar_prefetch = 0 : i64, scratch_operands = 0 : i64, tpu.core_type = #tpu.core_type<tc>, window_params = [{transform_indices = @transform_0, window_bounds = array<i64: 4, 32>}, {transform_indices = @transform_1, window_bounds = array<i64: 4, 32>}, {transform_indices = @transform_2, window_bounds = array<i64: 4, 32>}, {transform_indices = @transform_3, window_bounds = array<i64: 1, 1>}]} {
    %c0 = arith.constant 0 : index
    %c0_0 = arith.constant 0 : index
    %0 = vector.load %arg1[%c0, %c0_0] : memref<4x32xf32, #tpu.memory_space<vmem>>, vector<4x32xf32>
    %c0_1 = arith.constant 0 : index
    %c0_2 = arith.constant 0 : index
    %1 = vector.load %arg2[%c0_1, %c0_2] : memref<4x32xf32, #tpu.memory_space<vmem>>, vector<4x32xf32>
    %c0_3 = arith.constant 0 : index
    %c0_4 = arith.constant 0 : index
    %2 = vector.load %arg3[%c0_3, %c0_4] : memref<4x32xf32, #tpu.memory_space<vmem>>, vector<4x32xf32>
    %3 = arith.subf %0, %1 : vector<4x32xf32>
    %4 = math.absf %3 : vector<4x32xf32>
    %cst = arith.constant 5.000000e-01 : f32
    %5 = vector.broadcast %cst : f32 to vector<4x32xf32>
    %6 = arith.divf %4, %5 : vector<4x32xf32>
    %cst_5 = arith.constant 1.000000e+00 : f32
    %7 = vector.broadcast %cst_5 : f32 to vector<4x32xf32>
    %8 = arith.addf %7, %6 : vector<4x32xf32>
    %9 = math.log %8 : vector<4x32xf32>
    %cst_6 = arith.constant 2.000000e+01 : f32
    %10 = vector.broadcast %cst_6 : f32 to vector<4x32xf32>
    %11 = arith.mulf %10, %9 : vector<4x32xf32>
    %cst_7 = arith.constant -30.1887589 : f32
    %12 = vector.broadcast %cst_7 : f32 to vector<4x32xf32>
    %13 = arith.addf %11, %12 : vector<4x32xf32>
    %cst_8 = arith.constant 2.000000e+00 : f32
    %14 = vector.broadcast %cst_8 : f32 to vector<4x32xf32>
    %15 = arith.cmpf olt, %4, %14 : vector<4x32xf32>
    %16 = arith.select %15, %4, %13 : vector<4x32xi1>, vector<4x32xf32>
    %17 = arith.mulf %16, %2 : vector<4x32xf32>
    %18 = vector.shape_cast %17 : vector<4x32xf32> to vector<1x4x32xf32>
    %cst_9 = arith.constant dense<0.000000e+00> : vector<1xf32>
    %19 = vector.multi_reduction <add>, %18, %cst_9 [1, 2] : vector<1x4x32xf32> to vector<1xf32>
    %20 = vector.shape_cast %19 : vector<1xf32> to vector<1x1x1xf32>
    %21 = vector.extract %20[0, 0, 0] : f32 from vector<1x1x1xf32>
    %c0_10 = arith.constant 0 : index
    %c0_11 = arith.constant 0 : index
    %22 = memref.load %arg4[%c0_10, %c0_11] : memref<1x1xf32, #tpu.memory_space<smem>>
    memref.store %21, %arg4[%c0_10, %c0_11] : memref<1x1xf32, #tpu.memory_space<smem>>
    return
  }
  func.func @transform_0(%arg0: i32) -> (i32, i32) {
    %c0_i32 = arith.constant 0 : i32
    %c0_i32_0 = arith.constant 0 : i32
    return %arg0, %c0_i32 : i32, i32
  }
  func.func @transform_1(%arg0: i32) -> (i32, i32) {
    %c0_i32 = arith.constant 0 : i32
    %c0_i32_0 = arith.constant 0 : i32
    return %arg0, %c0_i32 : i32, i32
  }
  func.func @transform_2(%arg0: i32) -> (i32, i32) {
    %c0_i32 = arith.constant 0 : i32
    %c0_i32_0 = arith.constant 0 : i32
    return %arg0, %c0_i32 : i32, i32
  }
  func.func @transform_3(%arg0: i32) -> (i32, i32) {
    %c0_i32 = arith.constant 0 : i32
    %c0_i32_0 = arith.constant 0 : i32
    return %arg0, %c0_i32 : i32, i32
  }
}

</mosaic_0001>

<bundles_post_ra>
// kernel: tpu_custom_call.1
= control target key start
LH: loop header
LB: loop body
LE: loop exit
PB: predicated region body
PF: predicated region fallthrough
CT: control target
= control target key end

     0   :  { %8 = vsyncpa [#allocation3], 0  ;;  %s211_s0 = inlined_call_operand.hbm [shape: f32[4,32], index: 0, kind: input, shape index: {}]   ;;  %s212_s1 = inlined_call_operand.hbm [shape: f32[4,32], index: 1, kind: input, shape index: {}]   ;;  %s213_s2 = inlined_call_operand.hbm [shape: f32[4,32], index: 2, kind: input, shape index: {}]   ;;  %s214_s3 = inlined_call_operand.hbm [shape: f32[1,1], index: 3, kind: output, shape index: {}]  }
   0x1   :  { %9 = vsyncpa [#allocation6], 0 }
   0x2   :  { %10 = vsyncpa [#allocation4], 0  ;;  %s175_s12 = smov [#allocation5]   ;;  %s176_s14 = smov [#allocation2]  }
   0x3   :  { %s27_s13 = sshll.u32 %s175_s12, 4  ;;  %s17_s15 = sshll.u32 %s176_s14, 4  ;;  %s28_s13 = int_to_ptr.vmem [resolvable:$true] %s27_s13  ;;  %s18_s15 = int_to_ptr.vmem [resolvable:$true] %s17_s15 }
   0x4   :  { %s109_s16 = scalar_lea.vmem %s28_s13, 64  ;;  %p114_p1 = scmp.lt.s32.totalorder %s28_s13, %s28_s13 }
   0x5   :  { %p110_p0 = scmp.ne.s32.totalorder %s28_s13, %s109_s16  ;;  %p115_p2 = scmp.lt.s32.totalorder %s109_s16, %s109_s16 }
   0x7   :  { %p116_p3 = por %p115_p2, %p114_p1 }
   0x9   :  { %p117_p4 = pnand %p116_p3, %p110_p0 }
   0xb   :  { %120 = shalt.err (!%p117_p4)
}
   0xc   :  { %30 = dma.hbm_to_vmem [thread:$0]  %s212_s1, 64, %s28_s13, [#allocation6]  }
   0xd   :  { %s129_s19 = scalar_lea.vmem %s18_s15, 64  ;;  %p134_p6 = scmp.lt.s32.totalorder %s18_s15, %s18_s15 }
   0xe   :  { %p130_p5 = scmp.ne.s32.totalorder %s18_s15, %s129_s19  ;;  %p135_p7 = scmp.lt.s32.totalorder %s129_s19, %s129_s19 }
  0x10   :  { %p136_p8 = por %p135_p7, %p134_p6 }
  0x12   :  { %p137_p9 = pnand %p136_p8, %p130_p5 }
  0x14   :  { %140 = shalt.err (!%p137_p9)
}
  0x15   :  { %20 = dma.hbm_to_vmem [thread:$0]  %s211_s0, 64, %s18_s15, [#allocation3]  }
  0x16   :  { %s177_s22 = smov [#allocation7]  }
  0x17   :  { %s37_s23 = sshll.u32 %s177_s22, 4  ;;  %s38_s23 = int_to_ptr.vmem [resolvable:$true] %s37_s23 }
  0x18   :  { %s149_s24 = scalar_lea.vmem %s38_s23, 64  ;;  %p154_p11 = scmp.lt.s32.totalorder %s38_s23, %s38_s23 }
  0x19   :  { %p150_p10 = scmp.ne.s32.totalorder %s38_s23, %s149_s24  ;;  %p155_p12 = scmp.lt.s32.totalorder %s149_s24, %s149_s24 }
  0x1b   :  { %p156_p13 = por %p155_p12, %p154_p11 }
  0x1d   :  { %p157_p0 = pnand %p156_p13, %p150_p10 }
  0x1f   :  { %160 = shalt.err (!%p157_p0)
}
  0x20   :  { %40 = dma.hbm_to_vmem [thread:$0]  %s213_s2, 64, %s38_s23, [#allocation6]  }
  0x21   :  { %169 = dma.done.wait [#allocation3], 64  }
  0x22   :  { %170 = vsyncadd [#allocation3], 4294967232 }
  0x23   :  { %171 = dma.done.wait [#allocation6], 128  }
  0x24   :  { %172 = vsyncadd [#allocation6], 4294967168  ;;  %v50_v0 = vld [vmem:[#allocation2] sm:$0xf]  ;;  %v51_v1 = vld [vmem:[#allocation5] sm:$0xf] }
  0x25   :  { %v53_v2 = vsub.f32 %v50_v0, %v51_v1  ;;  %v52_v9 = vld [vmem:[#allocation7] sm:$0xf]  ;;  %vm65_vm1 = vcmask 257024   ;;  %s178_s2 = smov [#allocation8]  }
  0x27   :  { %v54_v3 = vand.u32 2147483647, %v53_v2 }
  0x29   :  { %v56_v4 = vmul.f32 2.0, %v54_v3  ;;  %vm62_vm0 = vcmp.lt.f32.partialorder %v54_v3, 2.0 }
  0x2b   :  { %v57_v5 = vadd.f32 1.0, %v56_v4 }
  0x2d   :  { %99 = vlog2.f32 %v57_v5 }
  0x3a   :  { %v100_v6 = vpop.eup %99 }
  0x3b   :  { %v59_v7 = vmul.f32 0.6931472, %v100_v6 }
  0x3d   :  { %v60_v8 = vmul.f32 20.0, %v59_v7 }
  0x3f   :  { %v61_v10 = vadd.f32 -30.188759, %v60_v8 }
  0x41   :  { %v63_v11 = vsel %vm62_vm0, %v54_v3, %v61_v10 }
  0x42   :  { %v64_v12 = vmul.f32 %v63_v11, %v52_v9 }
  0x44   :  { %v66_v13 = vsel %vm65_vm1, %v64_v12, 0.0 }
  0x45   :  { %67 = vadd.xlane.f32.xlu0 %v66_v13 }
  0xce   :  { %v68_v14 = vpop.xlane.xlu0 %67 }
  0xcf   :  { %v69_v15 = vrot.slane %v68_v14, 4 }
  0xd1   :  { %v70_v16 = vadd.f32 %v69_v15, %v68_v14 }
  0xd3   :  { %v71_v17 = vrot.slane %v70_v16, 2 }
  0xd5   :  { %v72_v18 = vadd.f32 %v71_v17, %v70_v16 }
  0xd7   :  { %v73_v19 = vrot.slane %v72_v18, 1 }
  0xd9   :  { %v74_v20 = vadd.f32 %v73_v19, %v72_v18 }
  0xdb   :  { %93 = vpush %v74_v20 }
 0x10c   :  { %s94_s0 = spop %93 }
 0x10d   :  { %77 = sst [smem:[#allocation8]] %s94_s0 }
 0x10e   :  { %85 = dma.smem_to_hbm %s178_s2, 16, %s214_s3, [#allocation4]  }
 0x10f   :  { %173 = dma.done.wait [#allocation4], 16  }
 0x110   :  { %174 = vsyncadd [#allocation4], 4294967280 }
 0x111   :  { %89 = sfence }
 0x112   :  { %90 = vsyncpa [#allocation3], 1 }
 0x113   :  { %91 = vsyncpa [#allocation6], 1 }
 0x114   :  { %92 = vsyncpa [#allocation4], 1 }

</bundles_post_ra>
